<compile_context>
chip_gen: v7x
topology: tpu7x:2x2x1
jax: 0.10.0
libtpu: 0.0.40
codegen_flags: <defaults>
</compile_context>

<pallas_src>
import functools

import jax
import jax.numpy as jnp
from jax.experimental import pallas as pl
from jax.experimental.pallas import tpu as pltpu

_EPS = 1e-6           # F.pairwise_distance default eps
_ROW_TILE_CAP = 1024  # bounds the lane-sparse (tb, 1) temporaries


def _round_up(x, m):
    return ((x + m - 1) // m) * m


def _sublane_multiple(dtype):
    # Sublane packing granule: 8 rows for 32-bit, 16 for 16-bit, 32 for 8-bit.
    bits = jnp.dtype(dtype).itemsize * 8
    return max(8, 256 // bits)


def _target_block_bytes():
    """Per-generation padded-block byte target (per-step overhead amortization)."""
    kind = ""
    try:
        kind = jax.devices()[0].device_kind.lower()
    except Exception:
        pass
    if "v5 lite" in kind or "v5e" in kind or "v5lite" in kind:
        return 2 * 1024 * 1024          # v5e: already <7% per-step overhead at 2 MiB
    if "v6" in kind:
        return 4 * 1024 * 1024          # v6e
    if "7x" in kind or "v7" in kind:
        return 7 * 1024 * 1024          # v7x: 3.2 TB/s HBM needs bigger steps
    return 4 * 1024 * 1024


def _vmem_capacity_bytes():
    try:
        return int(pltpu.get_tpu_info().vmem_capacity_bytes)
    except Exception:
        return 64 * 1024 * 1024          # conservative (v7x per-core VMEM)


def _pick_row_tile(batch, feat, itemsize, sublane, target_block_bytes):
    """Largest row tile whose *lane-padded* input block stays near the target."""
    feat_padded = _round_up(feat, 128)          # VMEM blocks pad lanes to 128
    tb = max(1, target_block_bytes // (feat_padded * itemsize))
    tb = min(tb, _ROW_TILE_CAP, batch)
    if tb < batch:
        # second-minor block dim must be a multiple of the sublane granule
        # unless it spans the full array dim
        tb = max(sublane, (tb // sublane) * sublane)
    return int(tb)


def _contrastive_loss_kernel(o1_ref, o2_ref, label_ref, out_ref, *,
                             margin, batch, tile, label_is_full, mask_needed):
    i = pl.program_id(0)

    o1 = o1_ref[...].astype(jnp.float32)          # (tile, D)
    o2 = o2_ref[...].astype(jnp.float32)          # (tile, D)

    if label_is_full:
        # Whole (padded) label is resident in VMEM; slice this tile's rows.
        row0 = i * tile
        if tile % 8 == 0:
            row0 = pl.multiple_of(row0, 8)
        label = label_ref[pl.ds(row0, tile), :].astype(jnp.float32)   # (tile, 1)
    else:
        label = label_ref[...].astype(jnp.float32)                    # (tile, 1)

    diff = o1 - o2 + _EPS                                      # (tile, D)
    sq_sum = jnp.sum(diff * diff, axis=-1, keepdims=True)      # (tile, 1) == d^2
    dist = jnp.sqrt(sq_sum)                                    # only feeds the hinge
    hinge = jnp.maximum(margin - dist, 0.0)
    row_loss = (1.0 - label) * sq_sum + label * (hinge * hinge)   # (tile, 1)

    if mask_needed:
        # Only the last tile can run past B; trace-time guard keeps this out of
        # the kernel entirely when B divides the tile size.
        rows = jax.lax.broadcasted_iota(jnp.int32, row_loss.shape, 0) + i * tile
        row_loss = jnp.where(rows < batch, row_loss, 0.0)

    out_ref[0, 0] = jnp.sum(row_loss)       # per-tile partial sum -> SMEM block


def contrastive_loss(output1, output2, label, margin=2.0, *,
                     block_rows=None, label_vmem_cap_bytes=2 * 1024 * 1024):
    """Pallas TPU implementation of ContrastiveLoss.forward (returns a scalar)."""
    B, D = output1.shape
    assert output2.shape == (B, D)
    label = jnp.reshape(label, (B, 1)).astype(jnp.float32)

    itemsize = jnp.dtype(output1.dtype).itemsize
    sublane = _sublane_multiple(output1.dtype)

    if block_rows is None:
        tb = _pick_row_tile(B, D, itemsize, sublane, _target_block_bytes())
    else:
        tb = min(int(block_rows), B)
        if tb < B:
            tb = max(sublane, (tb // sublane) * sublane)
    grid = pl.cdiv(B, tb)
    mask_needed = (B % tb) != 0

    # Label placement: a small label lives once in VMEM ((rows,1) f32 pads to
    # 128 lanes -> 512 B/row); large labels fall back to per-tile blocks.
    padded_rows = grid * tb
    label_full_bytes = _round_up(padded_rows, 8) * 128 * 4
    label_is_full = label_full_bytes <= label_vmem_cap_bytes
    if label_is_full:
        if padded_rows > B:
            label = jnp.pad(label, ((0, padded_rows - B), (0, 0)))
        label_spec = pl.BlockSpec(memory_space=pltpu.MemorySpace.VMEM)
        label_resident = label_full_bytes
    else:
        label_spec = pl.BlockSpec((tb, 1), lambda i: (i, 0))
        label_resident = 2 * _round_up(tb, 8) * 128 * 4     # double-buffered, padded

    # VMEM limit from the actual lane-padded resident footprint plus slack for
    # the lane-sparse (tb, 1) temporaries, clamped to 3/4 of physical VMEM.
    d_pad = _round_up(D, 128)
    tb_pad = _round_up(tb, sublane)
    block_bytes = tb_pad * d_pad * itemsize
    resident = 2 * 2 * block_bytes + label_resident          # 2 inputs x 2 buffers
    temp_slack = 8 * _round_up(tb, 8) * 128 * 4 + (2 << 20)
    vmem_limit = max(resident + temp_slack, 32 * 1024 * 1024)
    vmem_limit = min(vmem_limit, (_vmem_capacity_bytes() * 3) // 4)

    kernel = functools.partial(
        _contrastive_loss_kernel, margin=float(margin), batch=B, tile=tb,
        label_is_full=label_is_full, mask_needed=mask_needed)

    cost = pl.CostEstimate(
        flops=4 * B * D + 8 * B,           # sub, add-eps, mul, reduce + row epilogue
        transcendentals=B,                 # one sqrt per row
        bytes_accessed=2 * B * D * itemsize + B * 4 + grid * 4,
    )

    partials = pl.pallas_call(
        kernel,
        out_shape=jax.ShapeDtypeStruct((grid, 1), jnp.float32),
        grid=(grid,),
        in_specs=[
            pl.BlockSpec((tb, D), lambda i: (i, 0)),
            pl.BlockSpec((tb, D), lambda i: (i, 0)),
            label_spec,
        ],
        out_specs=pl.BlockSpec((1, 1), lambda i: (i, 0),
                               memory_space=pltpu.MemorySpace.SMEM),
        compiler_params=pltpu.CompilerParams(
            dimension_semantics=("parallel",),   # independent per-tile partials
            vmem_limit_bytes=int(vmem_limit),
        ),
        cost_estimate=cost,
    )(output1, output2, label)

    return jnp.sum(partials) / B


def _reference_loss(output1, output2, label, margin=2.0):
    # Pure-JAX reference mirroring the PyTorch module.
    diff = output1.astype(jnp.float32) - output2.astype(jnp.float32) + _EPS
    dist = jnp.sqrt(jnp.sum(diff * diff, axis=-1, keepdims=True))
    label = jnp.reshape(label, (-1, 1)).astype(jnp.float32)
    return jnp.mean((1.0 - label) * dist ** 2
                    + label * jnp.maximum(margin - dist, 0.0) ** 2)


if __name__ == "__main__":
    key = jax.random.PRNGKey(0)

    def check(B, D, dtype, **kwargs):
        k1, k2, k3 = jax.random.split(jax.random.fold_in(key, B * 131 + D), 3)
        o1 = jax.random.normal(k1, (B, D), dtype=jnp.float32).astype(dtype)
        o2 = jax.random.normal(k2, (B, D), dtype=jnp.float32).astype(dtype)
        lbl = jax.random.bernoulli(k3, 0.5, (B, 1)).astype(jnp.float32)
        got = jax.block_until_ready(
            contrastive_loss(o1, o2, lbl, margin=2.0, **kwargs))
        ref = _reference_loss(o1, o2, lbl, margin=2.0)
        assert jnp.allclose(got, ref, rtol=1e-5, atol=1e-5), (B, D, dtype, got, ref)

    # Siamese-net sized embeddings (single tile, label resident in VMEM).
    check(8, 32, jnp.float32)
    # Multi-tile, bf16 inputs (sublane granule 16), full-label pl.ds slicing.
    check(48, 40, jnp.bfloat16, block_rows=16)
    # Multi-tile with a partial last tile (mask path) and tiled-label fallback.
    check(20, 32, jnp.float32, block_rows=8, label_vmem_cap_bytes=0)

    print("KERNEL_OK")
</pallas_src>

<mosaic_0001>
module attributes {stable_mosaic.version = 11 : i64} {
  func.func @_contrastive_loss_kernel(%arg0: i32, %arg1: memref<8x32xf32, #tpu.memory_space<vmem>>, %arg2: memref<8x32xf32, #tpu.memory_space<vmem>>, %arg3: memref<8x1xf32, #tpu.memory_space<vmem>>, %arg4: memref<1x1xf32, #tpu.memory_space<smem>>) attributes {dimension_semantics = [#tpu.dimension_semantics<parallel>], iteration_bounds = array<i64: 1>, scalar_prefetch = 0 : i64, scratch_operands = 0 : i64, tpu.core_type = #tpu.core_type<tc>, window_params = [{transform_indices = @transform_0, window_bounds = array<i64: 8, 32>}, {transform_indices = @transform_1, window_bounds = array<i64: 8, 32>}, {pipeline_mode = #tpu.pipeline_mode<synchronous>, transform_indices = @transform_2, window_bounds = array<i64: 8, 1>}, {transform_indices = @transform_3, window_bounds = array<i64: 1, 1>}]} {
    %c0 = arith.constant 0 : index
    %c0_0 = arith.constant 0 : index
    %0 = vector.load %arg1[%c0, %c0_0] : memref<8x32xf32, #tpu.memory_space<vmem>>, vector<8x32xf32>
    %c0_1 = arith.constant 0 : index
    %c0_2 = arith.constant 0 : index
    %1 = vector.load %arg2[%c0_1, %c0_2] : memref<8x32xf32, #tpu.memory_space<vmem>>, vector<8x32xf32>
    %c8_i32 = arith.constant 8 : i32
    %2 = arith.muli %arg0, %c8_i32 : i32
    %3 = tpu.assume_multiple %2, 8 : i32
    %4 = arith.index_cast %3 : i32 to index
    %c0_3 = arith.constant 0 : index
    %5 = vector.load %arg3[%4, %c0_3] : memref<8x1xf32, #tpu.memory_space<vmem>>, vector<8x1xf32>
    %6 = arith.subf %0, %1 : vector<8x32xf32>
    %cst = arith.constant 9.99999997E-7 : f32
    %7 = vector.broadcast %cst : f32 to vector<8x32xf32>
    %8 = arith.addf %6, %7 : vector<8x32xf32>
    %9 = arith.mulf %8, %8 : vector<8x32xf32>
    %cst_4 = arith.constant dense<0.000000e+00> : vector<8xf32>
    %10 = vector.multi_reduction <add>, %9, %cst_4 [1] : vector<8x32xf32> to vector<8xf32>
    %11 = vector.shape_cast %10 : vector<8xf32> to vector<8x1xf32>
    %12 = math.sqrt %11 : vector<8x1xf32>
    %cst_5 = arith.constant 2.000000e+00 : f32
    %13 = vector.broadcast %cst_5 : f32 to vector<8x1xf32>
    %14 = arith.subf %13, %12 : vector<8x1xf32>
    %cst_6 = arith.constant 0.000000e+00 : f32
    %15 = vector.broadcast %cst_6 : f32 to vector<8x1xf32>
    %16 = arith.maximumf %14, %15 : vector<8x1xf32>
    %cst_7 = arith.constant 1.000000e+00 : f32
    %17 = vector.broadcast %cst_7 : f32 to vector<8x1xf32>
    %18 = arith.subf %17, %5 : vector<8x1xf32>
    %19 = arith.mulf %18, %11 : vector<8x1xf32>
    %20 = arith.mulf %16, %16 : vector<8x1xf32>
    %21 = arith.mulf %5, %20 : vector<8x1xf32>
    %22 = arith.addf %19, %21 : vector<8x1xf32>
    %23 = vector.shape_cast %22 : vector<8x1xf32> to vector<1x8x1xf32>
    %cst_8 = arith.constant dense<0.000000e+00> : vector<1xf32>
    %24 = vector.multi_reduction <add>, %23, %cst_8 [1, 2] : vector<1x8x1xf32> to vector<1xf32>
    %25 = vector.shape_cast %24 : vector<1xf32> to vector<1x1x1xf32>
    %26 = vector.extract %25[0, 0, 0] : f32 from vector<1x1x1xf32>
    %c0_9 = arith.constant 0 : index
    %c0_10 = arith.constant 0 : index
    %27 = memref.load %arg4[%c0_9, %c0_10] : memref<1x1xf32, #tpu.memory_space<smem>>
    memref.store %26, %arg4[%c0_9, %c0_10] : memref<1x1xf32, #tpu.memory_space<smem>>
    return
  }
  func.func @transform_0(%arg0: i32) -> (i32, i32) {
    %c0_i32 = arith.constant 0 : i32
    %c0_i32_0 = arith.constant 0 : i32
    return %arg0, %c0_i32 : i32, i32
  }
  func.func @transform_1(%arg0: i32) -> (i32, i32) {
    %c0_i32 = arith.constant 0 : i32
    %c0_i32_0 = arith.constant 0 : i32
    return %arg0, %c0_i32 : i32, i32
  }
  func.func @transform_2(%arg0: i32) -> (i32, i32) {
    %c0_i32 = arith.constant 0 : i32
    %c0_i32_0 = arith.constant 0 : i32
    %c0_i32_1 = arith.constant 0 : i32
    return %c0_i32, %c0_i32_0 : i32, i32
  }
  func.func @transform_3(%arg0: i32) -> (i32, i32) {
    %c0_i32 = arith.constant 0 : i32
    %c0_i32_0 = arith.constant 0 : i32
    return %arg0, %c0_i32 : i32, i32
  }
}

</mosaic_0001>

<bundles_post_ra>
// kernel: tpu_custom_call.1
= control target key start
LH: loop header
LB: loop body
LE: loop exit
PB: predicated region body
PF: predicated region fallthrough
CT: control target
= control target key end

     0   :  { %8 = vsyncpa [#allocation3], 0  ;;  %s174_s0 = inlined_call_operand.vmem [shape: f32[8,32], index: 0, kind: input, shape index: {}]   ;;  %s175_s1 = inlined_call_operand.hbm [shape: f32[8,32], index: 1, kind: input, shape index: {}]   ;;  %s176_s2 = inlined_call_operand.vmem [shape: f32[8,1], index: 2, kind: input, shape index: {}]   ;;  %s177_s3 = inlined_call_operand.hbm [shape: f32[1,1], index: 3, kind: output, shape index: {}]  }
   0x1   :  { %9 = vsyncpa [#allocation4], 0  ;;  %s122_s12 = smov [#allocation2]   ;;  %s86_s16 = scalar_lea.hbm %s175_s1, 128 }
   0x2   :  { %s18_s13 = sshll.u32 %s122_s12, 4  ;;  %p87_p0 = scmp.ne.s32.totalorder %s175_s1, %s86_s16  ;;  %s19_s13 = int_to_ptr.vmem [resolvable:$true] %s18_s13 }
   0x3   :  { %p90_p1 = scmp.lt.u32.totalorder %s86_s16, %s175_s1 }
   0x5   :  { %p92_p2 = pnand %p90_p1, %p87_p0 }
   0x7   :  { %95 = shalt.err (!%p92_p2)
}
   0x8   :  { %s96_s21 = scalar_lea.vmem %s19_s13, 128  ;;  %p101_p4 = scmp.lt.s32.totalorder %s19_s13, %s19_s13 }
   0x9   :  { %p97_p3 = scmp.ne.s32.totalorder %s19_s13, %s96_s21  ;;  %p102_p5 = scmp.lt.s32.totalorder %s96_s21, %s96_s21 }
   0xb   :  { %p103_p6 = por %p102_p5, %p101_p4 }
   0xd   :  { %p104_p7 = pnand %p103_p6, %p97_p3 }
   0xf   :  { %107 = shalt.err (!%p104_p7)
}
  0x10   :  { %21 = dma.hbm_to_vmem [thread:$0]  %s175_s1, 128, %s19_s13, [#allocation3]  }
  0x11   :  { %118 = dma.done.wait [#allocation3], 128  }
  0x12   :  { %119 = vsyncadd [#allocation3], 4294967168  ;;  %v27_v0 = vld [vmem:[%s174_s0] sm:$0xff]  ;;  %vm35_vm0 = vcmask 261120   ;;  %vm53_vm3 = vcmask 7168   ;;  %s108_s28 = scalar_lea.hbm %s177_s3, 16 }
  0x13   :  { %v28_v1 = vld [vmem:[#allocation2] sm:$0xff]  ;;  %p109_p8 = scmp.ne.s32.totalorder %s177_s3, %s108_s28  ;;  %p112_p9 = scmp.lt.u32.totalorder %s108_s28, %s177_s3 }
  0x14   :  { %v32_v2 = vsub.f32 %v27_v0, %v28_v1  ;;  %v31_v11 = vld [vmem:[%s176_s2] sm:$0xff] }
  0x15   :  { %v48_v15 = vsub.f32 1.0, %v31_v11  ;;  %p114_p10 = pnand %p112_p9, %p109_p8 }
  0x16   :  { %v33_v3 = vadd.f32 1e-06, %v32_v2 }
  0x18   :  { %v34_v4 = vmul.f32 %v33_v3, %v33_v3 }
  0x1a   :  { %v36_v5 = vsel %vm35_vm0, %v34_v4, 0.0 }
  0x1b   :  { %37 = vadd.xlane.f32.xlu0 %v36_v5 }
  0xa8   :  { %v38_v6 = vpop.xlane.xlu0 %37 }
  0xa9   :  { %84 = vrsqrt.f32 %v38_v6  ;;  %vm41_vm1 = vcmp.eq.f32.partialorder %v38_v6, inf  ;;  %v44_v9 = vand.u32 2147483648, %v38_v6  ;;  %vm43_vm2 = vcmp.eq.f32.partialorder %v38_v6, 0.0 }
  0xaa   :  { %v49_v17 = vmul.f32 %v48_v15, %v38_v6 }
  0xb3   :  { %v85_v7 = vpop.eup %84 }
  0xb4   :  { %v40_v8 = vmul.f32 %v85_v7, %v38_v6 }
  0xb6   :  { %v42_v10 = vsel %vm41_vm1, %v38_v6, %v40_v8 }
  0xb7   :  { %v45_v12 = vsel %vm43_vm2, %v44_v9, %v42_v10 }
  0xb8   :  { %v46_v13 = vsub.f32 2.0, %v45_v12 }
  0xba   :  { %v47_v14 = vmax.f32 %v46_v13, 0.0 }
  0xbc   :  { %v50_v16 = vmul.f32 %v47_v14, %v47_v14 }
  0xbe   :  { %v51_v18 = vmul.f32 %v50_v16, %v31_v11 }
  0xc0   :  { %v52_v19 = vadd.f32 %v51_v18, %v49_v17 }
  0xc2   :  { %v54_v20 = vsel %vm53_vm3, %v52_v19, 0.0 }
  0xc3   :  { %55 = vadd.xlane.f32.xlu0 %v54_v20 }
 0x150   :  { %v56_v21 = vpop.xlane.xlu0 %55 }
 0x151   :  { %v57_v22 = vrot.slane %v56_v21, 4 }
 0x153   :  { %v58_v23 = vadd.f32 %v57_v22, %v56_v21 }
 0x155   :  { %v59_v24 = vrot.slane %v58_v23, 2 }
 0x157   :  { %v60_v25 = vadd.f32 %v59_v24, %v58_v23 }
 0x159   :  { %v61_v26 = vrot.slane %v60_v25, 1 }
 0x15b   :  { %v62_v27 = vadd.f32 %v61_v26, %v60_v25 }
 0x15d   :  { %80 = vpush %v62_v27 }
 0x18e   :  { %s81_s0 = spop %80 }
 0x18f   :  { %65 = sst [smem:[#allocation5]] %s81_s0 }
 0x190   :  { %117 = shalt.err (!%p114_p10)
}
 0x191   :  { %s123_s6 = smov [#allocation5]  }
 0x192   :  { %73 = dma.smem_to_hbm %s123_s6, 16, %s177_s3, [#allocation4]  }
 0x193   :  { %120 = dma.done.wait [#allocation4], 16  }
 0x194   :  { %121 = vsyncadd [#allocation4], 4294967280 }
 0x195   :  { %77 = sfence }
 0x196   :  { %78 = vsyncpa [#allocation3], 1 }
 0x197   :  { %79 = vsyncpa [#allocation4], 1 }

</bundles_post_ra>
